<compile_context>
chip_gen: v7x
topology: tpu7x:2x2x1
jax: 0.10.0
libtpu: 0.0.40
codegen_flags: <defaults>
</compile_context>

<pallas_src>
import functools

import jax
import jax.numpy as jnp
from jax.experimental import pallas as pl
from jax.experimental.pallas import tpu as pltpu


def gnn_mp_kernel(feat_ref, adj_ref, w_emb_ref, b_emb_ref, w_lay_ref, b_lay_ref,
                  out_ref, *, n_layers, residual):
    G, N, d_in = feat_ref.shape
    _, max_n, out_dim = out_ref.shape
    hidden = w_emb_ref.shape[1]
    feat_dim = d_in + (n_layers + 1) * hidden       # out_dim == 2 * feat_dim

    feat = feat_ref[...]          # [G, N, D_in]  (columns already masked in wrapper)
    adj = adj_ref[...]            # [G, N, N], row-normalized (mean aggregation)

    # Initial embedding (h_0): fold all G graphs into the MXU M dimension.
    h2d = jnp.dot(feat.reshape(G * N, d_in), w_emb_ref[...],
                  preferred_element_type=jnp.float32)
    h = jnp.maximum(h2d + b_emb_ref[...], 0.0).reshape(G, N, hidden)

    layer_outs = [feat, h]        # layer_pooling == 'all'
    for l in range(n_layers):
        # Mean aggregation as an unrolled VPU multiply-accumulate over the (static)
        # neighbor axis -- avoids G serial tiny [NxN]@[NxH] MXU ops per layer.
        msg = adj[:, :, 0:1] * h[:, 0:1, :]
        for j in range(1, N):
            msg = msg + adj[:, :, j:j + 1] * h[:, j:j + 1, :]
        # Shared-weight transform: fold graphs back into the MXU M dimension.
        h_new = jnp.dot(msg.reshape(G * N, hidden), w_lay_ref[l],
                        preferred_element_type=jnp.float32)
        h_new = jnp.maximum(h_new + b_lay_ref[l], 0.0).reshape(G, N, hidden)
        h = h_new + h if residual else h_new
        layer_outs.append(h)

    node_feats = jnp.concatenate(layer_outs, axis=-1)           # [G, N, feat_dim]
    g_emb = jnp.max(node_feats, axis=1, keepdims=True)          # [G, 1, feat_dim]

    # Fused final output (single full-block store):
    #   lanes [0:feat_dim]          -> node features, rows N:max_n zero-padded
    #   lanes [feat_dim:2*feat_dim] -> per-graph max embedding, replicated over rows
    if max_n > N:
        padded_nodes = jnp.concatenate(
            [node_feats, jnp.zeros((G, max_n - N, feat_dim), jnp.float32)], axis=1)
    else:
        padded_nodes = node_feats
    emb_rep = jnp.broadcast_to(g_emb, (G, max_n, feat_dim))
    out_ref[...] = jnp.concatenate([padded_nodes, emb_rep], axis=-1)


def gnn_mp_forward(features, adj, w_emb, b_emb, w_lay, b_lay, *,
                   n_layers, residual, max_n_nodes, graphs_per_block=None):
    batch, n_nodes, d_in = features.shape
    hidden = w_emb.shape[1]
    feat_dim = d_in + hidden * (n_layers + 1)
    out_dim = 2 * feat_dim

    # features[:, 2:4] = 0 ; features[:, 10:] = 0  -- applied once, outside the kernel.
    # (Row-normalized adjacency with all-zero rows would NaN upstream; guard there.)
    col = jnp.arange(d_in)
    colmask = ((col >= 2) & (col < 4)) | (col >= 10)
    feat = jnp.where(colmask[None, None, :], 0.0, features.astype(jnp.float32))
    adj = adj.astype(jnp.float32)

    # Per-graph VMEM footprint: double-buffered pipeline blocks + in-kernel temporaries.
    block_bytes = 4 * (n_nodes * d_in + n_nodes * n_nodes + max_n_nodes * out_dim)
    temp_bytes = 4 * ((n_layers + 3) * n_nodes * hidden
                      + (2 * n_nodes + max_n_nodes + 1) * feat_dim
                      + 2 * max_n_nodes * out_dim)
    per_graph = 2 * block_bytes + temp_bytes

    if graphs_per_block is None:
        # Largest block that (a) amortizes the ~0.35us/step pipeline overhead and
        # (b) fits every generation's default scoped VMEM (16 MiB on v5e).  Pass
        # graphs_per_block=512..1024 on v6e/v7x; vmem_limit_bytes below scales with it.
        G = max(1, min(256, (12 << 20) // max(per_graph, 1), batch))
    else:
        G = max(1, graphs_per_block)

    grid_len = pl.cdiv(batch, G)
    padded_batch = grid_len * G
    if padded_batch != batch:
        pad = padded_batch - batch
        feat = jnp.pad(feat, ((0, pad), (0, 0), (0, 0)))
        adj = jnp.pad(adj, ((0, pad), (0, 0), (0, 0)))

    weight_bytes = 4 * (d_in * hidden + hidden + n_layers * hidden * (hidden + 1))
    vmem_limit = int(min(max(2 * (G * per_graph + 2 * weight_bytes), 32 << 20),
                         56 << 20))

    kernel = functools.partial(gnn_mp_kernel, n_layers=n_layers, residual=residual)

    flops = 2 * padded_batch * n_nodes * (
        d_in * hidden + n_layers * (n_nodes * hidden + hidden * hidden))
    bytes_accessed = 4 * (
        padded_batch * n_nodes * (d_in + n_nodes)            # feat + adj
        + grid_len * weight_bytes // 4                       # weights per grid step
        + padded_batch * max_n_nodes * out_dim)              # fused output

    out = pl.pallas_call(
        kernel,
        out_shape=jax.ShapeDtypeStruct((padded_batch, max_n_nodes, out_dim),
                                       jnp.float32),
        grid=(grid_len,),
        in_specs=[
            pl.BlockSpec((G, n_nodes, d_in), lambda b: (b, 0, 0)),
            pl.BlockSpec((G, n_nodes, n_nodes), lambda b: (b, 0, 0)),
            pl.BlockSpec((d_in, hidden), lambda b: (0, 0)),
            pl.BlockSpec((1, hidden), lambda b: (0, 0)),
            pl.BlockSpec((n_layers, hidden, hidden), lambda b: (0, 0, 0)),
            pl.BlockSpec((n_layers, 1, hidden), lambda b: (0, 0, 0)),
        ],
        out_specs=pl.BlockSpec((G, max_n_nodes, out_dim), lambda b: (b, 0, 0)),
        compiler_params=pltpu.CompilerParams(
            dimension_semantics=("parallel",),
            vmem_limit_bytes=vmem_limit),
        cost_estimate=pl.CostEstimate(flops=flops, transcendentals=0,
                                      bytes_accessed=bytes_accessed),
    )(feat, adj, w_emb, b_emb, w_lay, b_lay)

    if padded_batch != batch:
        out = out[:batch]
    return out


def gnn_mp_reference(features, adj, w_emb, b_emb, w_lay, b_lay, *,
                     n_layers, residual, max_n_nodes):
    """Pure-JAX reference of the same forward pass."""
    b, n, d = features.shape
    col = jnp.arange(d)
    mask = ((col >= 2) & (col < 4)) | (col >= 10)
    feat = jnp.where(mask[None, None, :], 0.0, features)
    h = jnp.maximum(jnp.einsum('bnd,dh->bnh', feat, w_emb) + b_emb, 0.0)
    outs = [feat, h]
    for l in range(n_layers):
        msg = jnp.einsum('bij,bjh->bih', adj, h)
        h_new = jnp.maximum(jnp.einsum('bnh,hk->bnk', msg, w_lay[l]) + b_lay[l], 0.0)
        h = h_new + h if residual else h_new
        outs.append(h)
    node_feats = jnp.concatenate(outs, axis=-1)
    g_emb = jnp.max(node_feats, axis=1, keepdims=True)
    padded = jnp.pad(node_feats, ((0, 0), (0, max_n_nodes - n), (0, 0)))
    repeated = jnp.broadcast_to(g_emb, padded.shape)
    return jnp.concatenate([padded, repeated], axis=-1)


if __name__ == "__main__":
    # small shapes consistent with the module
    batch = 2
    n_nodes = 8
    max_n_nodes = 16
    input_dim = 12                      # input_dim_features_extractor
    hidden_dim = 32                     # hidden_dim_features_extractor
    n_layers = 2                        # n_layers_features_extractor
    residual = True

    key = jax.random.PRNGKey(0)
    k_feat, k_adj, k_wemb, k_bemb, k_wlay, k_blay = jax.random.split(key, 6)

    features = jax.random.normal(k_feat, (batch, n_nodes, input_dim), jnp.float32)

    # dense adjacency with self loops (add_self_loops=True), row-normalized
    adj_raw = (jax.random.uniform(k_adj, (batch, n_nodes, n_nodes)) > 0.6)
    adj_raw = jnp.minimum(adj_raw.astype(jnp.float32) + jnp.eye(n_nodes)[None], 1.0)
    adj = adj_raw / adj_raw.sum(axis=-1, keepdims=True)

    # deterministic parameter init (synthetic, not a checkpoint load)
    w_emb = 0.1 * jax.random.normal(k_wemb, (input_dim, hidden_dim), jnp.float32)
    b_emb = 0.1 * jax.random.normal(k_bemb, (1, hidden_dim), jnp.float32)
    w_lay = 0.1 * jax.random.normal(k_wlay, (n_layers, hidden_dim, hidden_dim),
                                    jnp.float32)
    b_lay = 0.1 * jax.random.normal(k_blay, (n_layers, 1, hidden_dim), jnp.float32)

    out = gnn_mp_forward(features, adj, w_emb, b_emb, w_lay, b_lay,
                         n_layers=n_layers, residual=residual,
                         max_n_nodes=max_n_nodes)
    out = jax.block_until_ready(out)

    ref = gnn_mp_reference(features, adj, w_emb, b_emb, w_lay, b_lay,
                           n_layers=n_layers, residual=residual,
                           max_n_nodes=max_n_nodes)
    assert out.shape == (batch, max_n_nodes,
                         2 * (input_dim + hidden_dim * (n_layers + 1)))
    assert jnp.allclose(out, ref, atol=1e-4, rtol=1e-4)

    print("KERNEL_OK")
</pallas_src>

<mosaic_0001>
module attributes {stable_mosaic.version = 11 : i64} {
  func.func @gnn_mp_kernel(%arg0: i32, %arg1: memref<2x8x12xf32, #tpu.memory_space<vmem>>, %arg2: memref<2x8x8xf32, #tpu.memory_space<vmem>>, %arg3: memref<12x32xf32, #tpu.memory_space<vmem>>, %arg4: memref<1x32xf32, #tpu.memory_space<vmem>>, %arg5: memref<2x32x32xf32, #tpu.memory_space<vmem>>, %arg6: memref<2x1x32xf32, #tpu.memory_space<vmem>>, %arg7: memref<2x16x216xf32, #tpu.memory_space<vmem>>) attributes {dimension_semantics = [#tpu.dimension_semantics<parallel>], iteration_bounds = array<i64: 1>, scalar_prefetch = 0 : i64, scratch_operands = 0 : i64, tpu.core_type = #tpu.core_type<tc>, window_params = [{transform_indices = @transform_0, window_bounds = array<i64: 2, 8, 12>}, {transform_indices = @transform_1, window_bounds = array<i64: 2, 8, 8>}, {pipeline_mode = #tpu.pipeline_mode<synchronous>, transform_indices = @transform_2, window_bounds = array<i64: 12, 32>}, {pipeline_mode = #tpu.pipeline_mode<synchronous>, transform_indices = @transform_3, window_bounds = array<i64: 1, 32>}, {pipeline_mode = #tpu.pipeline_mode<synchronous>, transform_indices = @transform_4, window_bounds = array<i64: 2, 32, 32>}, {pipeline_mode = #tpu.pipeline_mode<synchronous>, transform_indices = @transform_5, window_bounds = array<i64: 2, 1, 32>}, {transform_indices = @transform_6, window_bounds = array<i64: 2, 16, 216>}]} {
    %c0 = arith.constant 0 : index
    %c0_0 = arith.constant 0 : index
    %c0_1 = arith.constant 0 : index
    %0 = vector.load %arg1[%c0, %c0_0, %c0_1] : memref<2x8x12xf32, #tpu.memory_space<vmem>>, vector<2x8x12xf32>
    %c0_2 = arith.constant 0 : index
    %c0_3 = arith.constant 0 : index
    %c0_4 = arith.constant 0 : index
    %1 = vector.load %arg2[%c0_2, %c0_3, %c0_4] : memref<2x8x8xf32, #tpu.memory_space<vmem>>, vector<2x8x8xf32>
    %2 = vector.shape_cast %0 : vector<2x8x12xf32> to vector<16x12xf32>
    %c0_5 = arith.constant 0 : index
    %c0_6 = arith.constant 0 : index
    %3 = vector.load %arg3[%c0_5, %c0_6] : memref<12x32xf32, #tpu.memory_space<vmem>>, vector<12x32xf32>
    %cst = arith.constant dense<0.000000e+00> : vector<16x32xf32>
    %4 = tpu.matmul %2, %3, %cst {dimension_numbers = #tpu.dot_dimension_numbers<[1], [0], [0], [1], [0, 0, 1, 1], [], []>} : vector<16x12xf32>, vector<12x32xf32>, vector<16x32xf32> -> vector<16x32xf32>
    %c0_7 = arith.constant 0 : index
    %c0_8 = arith.constant 0 : index
    %5 = vector.load %arg4[%c0_7, %c0_8] : memref<1x32xf32, #tpu.memory_space<vmem>>, vector<1x32xf32>
    %6 = vector.broadcast %5 : vector<1x32xf32> to vector<16x32xf32>
    %7 = arith.addf %4, %6 : vector<16x32xf32>
    %cst_9 = arith.constant 0.000000e+00 : f32
    %8 = vector.broadcast %cst_9 : f32 to vector<16x32xf32>
    %9 = arith.maximumf %7, %8 : vector<16x32xf32>
    %10 = vector.shape_cast %9 : vector<16x32xf32> to vector<2x8x32xf32>
    %11 = vector.extract_strided_slice %1 {offsets = [0, 0, 0], sizes = [2, 8, 1], strides = [1, 1, 1]} : vector<2x8x8xf32> to vector<2x8x1xf32>
    %12 = vector.extract_strided_slice %10 {offsets = [0, 0, 0], sizes = [2, 1, 32], strides = [1, 1, 1]} : vector<2x8x32xf32> to vector<2x1x32xf32>
    %13 = vector.broadcast %11 : vector<2x8x1xf32> to vector<2x8x32xf32>
    %14 = vector.broadcast %12 : vector<2x1x32xf32> to vector<2x8x32xf32>
    %15 = arith.mulf %13, %14 : vector<2x8x32xf32>
    %16 = vector.extract_strided_slice %1 {offsets = [0, 0, 1], sizes = [2, 8, 1], strides = [1, 1, 1]} : vector<2x8x8xf32> to vector<2x8x1xf32>
    %17 = vector.extract_strided_slice %10 {offsets = [0, 1, 0], sizes = [2, 1, 32], strides = [1, 1, 1]} : vector<2x8x32xf32> to vector<2x1x32xf32>
    %18 = vector.broadcast %16 : vector<2x8x1xf32> to vector<2x8x32xf32>
    %19 = vector.broadcast %17 : vector<2x1x32xf32> to vector<2x8x32xf32>
    %20 = arith.mulf %18, %19 : vector<2x8x32xf32>
    %21 = arith.addf %15, %20 : vector<2x8x32xf32>
    %22 = vector.extract_strided_slice %1 {offsets = [0, 0, 2], sizes = [2, 8, 1], strides = [1, 1, 1]} : vector<2x8x8xf32> to vector<2x8x1xf32>
    %23 = vector.extract_strided_slice %10 {offsets = [0, 2, 0], sizes = [2, 1, 32], strides = [1, 1, 1]} : vector<2x8x32xf32> to vector<2x1x32xf32>
    %24 = vector.broadcast %22 : vector<2x8x1xf32> to vector<2x8x32xf32>
    %25 = vector.broadcast %23 : vector<2x1x32xf32> to vector<2x8x32xf32>
    %26 = arith.mulf %24, %25 : vector<2x8x32xf32>
    %27 = arith.addf %21, %26 : vector<2x8x32xf32>
    %28 = vector.extract_strided_slice %1 {offsets = [0, 0, 3], sizes = [2, 8, 1], strides = [1, 1, 1]} : vector<2x8x8xf32> to vector<2x8x1xf32>
    %29 = vector.extract_strided_slice %10 {offsets = [0, 3, 0], sizes = [2, 1, 32], strides = [1, 1, 1]} : vector<2x8x32xf32> to vector<2x1x32xf32>
    %30 = vector.broadcast %28 : vector<2x8x1xf32> to vector<2x8x32xf32>
    %31 = vector.broadcast %29 : vector<2x1x32xf32> to vector<2x8x32xf32>
    %32 = arith.mulf %30, %31 : vector<2x8x32xf32>
    %33 = arith.addf %27, %32 : vector<2x8x32xf32>
    %34 = vector.extract_strided_slice %1 {offsets = [0, 0, 4], sizes = [2, 8, 1], strides = [1, 1, 1]} : vector<2x8x8xf32> to vector<2x8x1xf32>
    %35 = vector.extract_strided_slice %10 {offsets = [0, 4, 0], sizes = [2, 1, 32], strides = [1, 1, 1]} : vector<2x8x32xf32> to vector<2x1x32xf32>
    %36 = vector.broadcast %34 : vector<2x8x1xf32> to vector<2x8x32xf32>
    %37 = vector.broadcast %35 : vector<2x1x32xf32> to vector<2x8x32xf32>
    %38 = arith.mulf %36, %37 : vector<2x8x32xf32>
    %39 = arith.addf %33, %38 : vector<2x8x32xf32>
    %40 = vector.extract_strided_slice %1 {offsets = [0, 0, 5], sizes = [2, 8, 1], strides = [1, 1, 1]} : vector<2x8x8xf32> to vector<2x8x1xf32>
    %41 = vector.extract_strided_slice %10 {offsets = [0, 5, 0], sizes = [2, 1, 32], strides = [1, 1, 1]} : vector<2x8x32xf32> to vector<2x1x32xf32>
    %42 = vector.broadcast %40 : vector<2x8x1xf32> to vector<2x8x32xf32>
    %43 = vector.broadcast %41 : vector<2x1x32xf32> to vector<2x8x32xf32>
    %44 = arith.mulf %42, %43 : vector<2x8x32xf32>
    %45 = arith.addf %39, %44 : vector<2x8x32xf32>
    %46 = vector.extract_strided_slice %1 {offsets = [0, 0, 6], sizes = [2, 8, 1], strides = [1, 1, 1]} : vector<2x8x8xf32> to vector<2x8x1xf32>
    %47 = vector.extract_strided_slice %10 {offsets = [0, 6, 0], sizes = [2, 1, 32], strides = [1, 1, 1]} : vector<2x8x32xf32> to vector<2x1x32xf32>
    %48 = vector.broadcast %46 : vector<2x8x1xf32> to vector<2x8x32xf32>
    %49 = vector.broadcast %47 : vector<2x1x32xf32> to vector<2x8x32xf32>
    %50 = arith.mulf %48, %49 : vector<2x8x32xf32>
    %51 = arith.addf %45, %50 : vector<2x8x32xf32>
    %52 = vector.extract_strided_slice %1 {offsets = [0, 0, 7], sizes = [2, 8, 1], strides = [1, 1, 1]} : vector<2x8x8xf32> to vector<2x8x1xf32>
    %53 = vector.extract_strided_slice %10 {offsets = [0, 7, 0], sizes = [2, 1, 32], strides = [1, 1, 1]} : vector<2x8x32xf32> to vector<2x1x32xf32>
    %54 = vector.broadcast %52 : vector<2x8x1xf32> to vector<2x8x32xf32>
    %55 = vector.broadcast %53 : vector<2x1x32xf32> to vector<2x8x32xf32>
    %56 = arith.mulf %54, %55 : vector<2x8x32xf32>
    %57 = arith.addf %51, %56 : vector<2x8x32xf32>
    %58 = vector.shape_cast %57 : vector<2x8x32xf32> to vector<16x32xf32>
    %c0_10 = arith.constant 0 : index
    %c0_11 = arith.constant 0 : index
    %c0_12 = arith.constant 0 : index
    %59 = vector.load %arg5[%c0_10, %c0_11, %c0_12] : memref<2x32x32xf32, #tpu.memory_space<vmem>>, vector<1x32x32xf32>
    %60 = vector.shape_cast %59 : vector<1x32x32xf32> to vector<32x32xf32>
    %cst_13 = arith.constant dense<0.000000e+00> : vector<16x32xf32>
    %61 = tpu.matmul %58, %60, %cst_13 {dimension_numbers = #tpu.dot_dimension_numbers<[1], [0], [0], [1], [0, 0, 1, 1], [], []>} : vector<16x32xf32>, vector<32x32xf32>, vector<16x32xf32> -> vector<16x32xf32>
    %c0_14 = arith.constant 0 : index
    %c0_15 = arith.constant 0 : index
    %c0_16 = arith.constant 0 : index
    %62 = vector.load %arg6[%c0_14, %c0_15, %c0_16] : memref<2x1x32xf32, #tpu.memory_space<vmem>>, vector<1x1x32xf32>
    %63 = vector.shape_cast %62 : vector<1x1x32xf32> to vector<1x32xf32>
    %64 = vector.broadcast %63 : vector<1x32xf32> to vector<16x32xf32>
    %65 = arith.addf %61, %64 : vector<16x32xf32>
    %cst_17 = arith.constant 0.000000e+00 : f32
    %66 = vector.broadcast %cst_17 : f32 to vector<16x32xf32>
    %67 = arith.maximumf %65, %66 : vector<16x32xf32>
    %68 = vector.shape_cast %67 : vector<16x32xf32> to vector<2x8x32xf32>
    %69 = arith.addf %68, %10 : vector<2x8x32xf32>
    %70 = vector.extract_strided_slice %1 {offsets = [0, 0, 0], sizes = [2, 8, 1], strides = [1, 1, 1]} : vector<2x8x8xf32> to vector<2x8x1xf32>
    %71 = vector.extract_strided_slice %69 {offsets = [0, 0, 0], sizes = [2, 1, 32], strides = [1, 1, 1]} : vector<2x8x32xf32> to vector<2x1x32xf32>
    %72 = vector.broadcast %70 : vector<2x8x1xf32> to vector<2x8x32xf32>
    %73 = vector.broadcast %71 : vector<2x1x32xf32> to vector<2x8x32xf32>
    %74 = arith.mulf %72, %73 : vector<2x8x32xf32>
    %75 = vector.extract_strided_slice %1 {offsets = [0, 0, 1], sizes = [2, 8, 1], strides = [1, 1, 1]} : vector<2x8x8xf32> to vector<2x8x1xf32>
    %76 = vector.extract_strided_slice %69 {offsets = [0, 1, 0], sizes = [2, 1, 32], strides = [1, 1, 1]} : vector<2x8x32xf32> to vector<2x1x32xf32>
    %77 = vector.broadcast %75 : vector<2x8x1xf32> to vector<2x8x32xf32>
    %78 = vector.broadcast %76 : vector<2x1x32xf32> to vector<2x8x32xf32>
    %79 = arith.mulf %77, %78 : vector<2x8x32xf32>
    %80 = arith.addf %74, %79 : vector<2x8x32xf32>
    %81 = vector.extract_strided_slice %1 {offsets = [0, 0, 2], sizes = [2, 8, 1], strides = [1, 1, 1]} : vector<2x8x8xf32> to vector<2x8x1xf32>
    %82 = vector.extract_strided_slice %69 {offsets = [0, 2, 0], sizes = [2, 1, 32], strides = [1, 1, 1]} : vector<2x8x32xf32> to vector<2x1x32xf32>
    %83 = vector.broadcast %81 : vector<2x8x1xf32> to vector<2x8x32xf32>
    %84 = vector.broadcast %82 : vector<2x1x32xf32> to vector<2x8x32xf32>
    %85 = arith.mulf %83, %84 : vector<2x8x32xf32>
    %86 = arith.addf %80, %85 : vector<2x8x32xf32>
    %87 = vector.extract_strided_slice %1 {offsets = [0, 0, 3], sizes = [2, 8, 1], strides = [1, 1, 1]} : vector<2x8x8xf32> to vector<2x8x1xf32>
    %88 = vector.extract_strided_slice %69 {offsets = [0, 3, 0], sizes = [2, 1, 32], strides = [1, 1, 1]} : vector<2x8x32xf32> to vector<2x1x32xf32>
    %89 = vector.broadcast %87 : vector<2x8x1xf32> to vector<2x8x32xf32>
    %90 = vector.broadcast %88 : vector<2x1x32xf32> to vector<2x8x32xf32>
    %91 = arith.mulf %89, %90 : vector<2x8x32xf32>
    %92 = arith.addf %86, %91 : vector<2x8x32xf32>
    %93 = vector.extract_strided_slice %1 {offsets = [0, 0, 4], sizes = [2, 8, 1], strides = [1, 1, 1]} : vector<2x8x8xf32> to vector<2x8x1xf32>
    %94 = vector.extract_strided_slice %69 {offsets = [0, 4, 0], sizes = [2, 1, 32], strides = [1, 1, 1]} : vector<2x8x32xf32> to vector<2x1x32xf32>
    %95 = vector.broadcast %93 : vector<2x8x1xf32> to vector<2x8x32xf32>
    %96 = vector.broadcast %94 : vector<2x1x32xf32> to vector<2x8x32xf32>
    %97 = arith.mulf %95, %96 : vector<2x8x32xf32>
    %98 = arith.addf %92, %97 : vector<2x8x32xf32>
    %99 = vector.extract_strided_slice %1 {offsets = [0, 0, 5], sizes = [2, 8, 1], strides = [1, 1, 1]} : vector<2x8x8xf32> to vector<2x8x1xf32>
    %100 = vector.extract_strided_slice %69 {offsets = [0, 5, 0], sizes = [2, 1, 32], strides = [1, 1, 1]} : vector<2x8x32xf32> to vector<2x1x32xf32>
    %101 = vector.broadcast %99 : vector<2x8x1xf32> to vector<2x8x32xf32>
    %102 = vector.broadcast %100 : vector<2x1x32xf32> to vector<2x8x32xf32>
    %103 = arith.mulf %101, %102 : vector<2x8x32xf32>
    %104 = arith.addf %98, %103 : vector<2x8x32xf32>
    %105 = vector.extract_strided_slice %1 {offsets = [0, 0, 6], sizes = [2, 8, 1], strides = [1, 1, 1]} : vector<2x8x8xf32> to vector<2x8x1xf32>
    %106 = vector.extract_strided_slice %69 {offsets = [0, 6, 0], sizes = [2, 1, 32], strides = [1, 1, 1]} : vector<2x8x32xf32> to vector<2x1x32xf32>
    %107 = vector.broadcast %105 : vector<2x8x1xf32> to vector<2x8x32xf32>
    %108 = vector.broadcast %106 : vector<2x1x32xf32> to vector<2x8x32xf32>
    %109 = arith.mulf %107, %108 : vector<2x8x32xf32>
    %110 = arith.addf %104, %109 : vector<2x8x32xf32>
    %111 = vector.extract_strided_slice %1 {offsets = [0, 0, 7], sizes = [2, 8, 1], strides = [1, 1, 1]} : vector<2x8x8xf32> to vector<2x8x1xf32>
    %112 = vector.extract_strided_slice %69 {offsets = [0, 7, 0], sizes = [2, 1, 32], strides = [1, 1, 1]} : vector<2x8x32xf32> to vector<2x1x32xf32>
    %113 = vector.broadcast %111 : vector<2x8x1xf32> to vector<2x8x32xf32>
    %114 = vector.broadcast %112 : vector<2x1x32xf32> to vector<2x8x32xf32>
    %115 = arith.mulf %113, %114 : vector<2x8x32xf32>
    %116 = arith.addf %110, %115 : vector<2x8x32xf32>
    %117 = vector.shape_cast %116 : vector<2x8x32xf32> to vector<16x32xf32>
    %c1 = arith.constant 1 : index
    %c0_18 = arith.constant 0 : index
    %c0_19 = arith.constant 0 : index
    %118 = vector.load %arg5[%c1, %c0_18, %c0_19] : memref<2x32x32xf32, #tpu.memory_space<vmem>>, vector<1x32x32xf32>
    %119 = vector.shape_cast %118 : vector<1x32x32xf32> to vector<32x32xf32>
    %cst_20 = arith.constant dense<0.000000e+00> : vector<16x32xf32>
    %120 = tpu.matmul %117, %119, %cst_20 {dimension_numbers = #tpu.dot_dimension_numbers<[1], [0], [0], [1], [0, 0, 1, 1], [], []>} : vector<16x32xf32>, vector<32x32xf32>, vector<16x32xf32> -> vector<16x32xf32>
    %c1_21 = arith.constant 1 : index
    %c0_22 = arith.constant 0 : index
    %c0_23 = arith.constant 0 : index
    %121 = vector.load %arg6[%c1_21, %c0_22, %c0_23] : memref<2x1x32xf32, #tpu.memory_space<vmem>>, vector<1x1x32xf32>
    %122 = vector.shape_cast %121 : vector<1x1x32xf32> to vector<1x32xf32>
    %123 = vector.broadcast %122 : vector<1x32xf32> to vector<16x32xf32>
    %124 = arith.addf %120, %123 : vector<16x32xf32>
    %cst_24 = arith.constant 0.000000e+00 : f32
    %125 = vector.broadcast %cst_24 : f32 to vector<16x32xf32>
    %126 = arith.maximumf %124, %125 : vector<16x32xf32>
    %127 = vector.shape_cast %126 : vector<16x32xf32> to vector<2x8x32xf32>
    %128 = arith.addf %127, %69 : vector<2x8x32xf32>
    %129 = tpu.concatenate %0, %10, %69, %128 in 2 : vector<2x8x12xf32>, vector<2x8x32xf32>, vector<2x8x32xf32>, vector<2x8x32xf32> -> vector<2x8x108xf32>
    %cst_25 = arith.constant dense<0xFF800000> : vector<2x108xf32>
    %130 = vector.multi_reduction <maximumf>, %129, %cst_25 [1] : vector<2x8x108xf32> to vector<2x108xf32>
    %131 = vector.shape_cast %130 : vector<2x108xf32> to vector<2x1x108xf32>
    %cst_26 = arith.constant 0.000000e+00 : f32
    %132 = vector.broadcast %cst_26 : f32 to vector<2x8x108xf32>
    %133 = tpu.concatenate %129, %132 in 1 : vector<2x8x108xf32>, vector<2x8x108xf32> -> vector<2x16x108xf32>
    %134 = vector.shape_cast %131 : vector<2x1x108xf32> to vector<2x1x108xf32>
    %135 = vector.broadcast %134 : vector<2x1x108xf32> to vector<2x16x108xf32>
    %136 = tpu.concatenate %133, %135 in 2 : vector<2x16x108xf32>, vector<2x16x108xf32> -> vector<2x16x216xf32>
    %c0_27 = arith.constant 0 : index
    %c0_28 = arith.constant 0 : index
    %c0_29 = arith.constant 0 : index
    %137 = vector.load %arg7[%c0_27, %c0_28, %c0_29] : memref<2x16x216xf32, #tpu.memory_space<vmem>>, vector<2x16x216xf32>
    tpu.vector_store %arg7[%c0_27, %c0_28, %c0_29], %136 {strides = array<i32>} : memref<2x16x216xf32, #tpu.memory_space<vmem>>, vector<2x16x216xf32>,
    return
  }
  func.func @transform_0(%arg0: i32) -> (i32, i32, i32) {
    %c0_i32 = arith.constant 0 : i32
    %c0_i32_0 = arith.constant 0 : i32
    %c0_i32_1 = arith.constant 0 : i32
    return %arg0, %c0_i32, %c0_i32_0 : i32, i32, i32
  }
  func.func @transform_1(%arg0: i32) -> (i32, i32, i32) {
    %c0_i32 = arith.constant 0 : i32
    %c0_i32_0 = arith.constant 0 : i32
    %c0_i32_1 = arith.constant 0 : i32
    return %arg0, %c0_i32, %c0_i32_0 : i32, i32, i32
  }
  func.func @transform_2(%arg0: i32) -> (i32, i32) {
    %c0_i32 = arith.constant 0 : i32
    %c0_i32_0 = arith.constant 0 : i32
    %c0_i32_1 = arith.constant 0 : i32
    return %c0_i32, %c0_i32_0 : i32, i32
  }
  func.func @transform_3(%arg0: i32) -> (i32, i32) {
    %c0_i32 = arith.constant 0 : i32
    %c0_i32_0 = arith.constant 0 : i32
    %c0_i32_1 = arith.constant 0 : i32
    return %c0_i32, %c0_i32_0 : i32, i32
  }
  func.func @transform_4(%arg0: i32) -> (i32, i32, i32) {
    %c0_i32 = arith.constant 0 : i32
    %c0_i32_0 = arith.constant 0 : i32
    %c0_i32_1 = arith.constant 0 : i32
    %c0_i32_2 = arith.constant 0 : i32
    return %c0_i32, %c0_i32_0, %c0_i32_1 : i32, i32, i32
  }
  func.func @transform_5(%arg0: i32) -> (i32, i32, i32) {
    %c0_i32 = arith.constant 0 : i32
    %c0_i32_0 = arith.constant 0 : i32
    %c0_i32_1 = arith.constant 0 : i32
    %c0_i32_2 = arith.constant 0 : i32
    return %c0_i32, %c0_i32_0, %c0_i32_1 : i32, i32, i32
  }
  func.func @transform_6(%arg0: i32) -> (i32, i32, i32) {
    %c0_i32 = arith.constant 0 : i32
    %c0_i32_0 = arith.constant 0 : i32
    %c0_i32_1 = arith.constant 0 : i32
    return %arg0, %c0_i32, %c0_i32_0 : i32, i32, i32
  }
}

</mosaic_0001>

<bundles_post_ra>
// kernel: tpu_custom_call.1
= control target key start
LH: loop header
LB: loop body
LE: loop exit
PB: predicated region body
PF: predicated region fallthrough
CT: control target
= control target key end

     0   :  { %11 = vsyncpa [#allocation3], 0  ;;  %s1258_s0 = inlined_call_operand.hbm [shape: f32[2,8,12], index: 0, kind: input, shape index: {}]   ;;  %s1259_s1 = inlined_call_operand.hbm [shape: f32[2,8,8], index: 1, kind: input, shape index: {}]   ;;  %s1260_s2 = inlined_call_operand.hbm [shape: f32[12,32], index: 2, kind: input, shape index: {}]   ;;  %s1261_s3 = inlined_call_operand.vmem [shape: f32[1,32], index: 3, kind: input, shape index: {}]   ;;  %s1262_s4 = inlined_call_operand.hbm [shape: f32[2,32,32], index: 4, kind: input, shape index: {}]   ;;  %s1263_s5 = inlined_call_operand.vmem [shape: f32[2,1,32], index: 5, kind: input, shape index: {}]   ;;  %s1264_s6 = inlined_call_operand.hbm [shape: f32[2,16,216], index: 6, kind: output, shape index: {}]  }
   0x1   :  { %12 = vsyncpa [#allocation6], 0 }
   0x2   :  { %13 = vsyncpa [#allocation9], 0 }
   0x3   :  { %14 = vsyncpa [#allocation4], 0  ;;  %s948_s21 = smov [#allocation5]   ;;  %s949_s23 = smov [#allocation2]  }
   0x4   :  { %s32_s22 = sshll.u32 %s948_s21, 4  ;;  %s20_s24 = sshll.u32 %s949_s23, 4  ;;  %s33_s22 = int_to_ptr.vmem [resolvable:$true] %s32_s22  ;;  %s1005_s24 = int_to_ptr.vmem [resolvable:$true] %s20_s24 }
   0x5   :  { %s830_s27 = scalar_lea.hbm %s1259_s1, 256 }
   0x6   :  { %p831_p0 = scmp.ne.s32.totalorder %s1259_s1, %s830_s27  ;;  %p834_p1 = scmp.lt.u32.totalorder %s830_s27, %s1259_s1 }
   0x8   :  { %p836_p2 = pnand %p834_p1, %p831_p0 }
   0xa   :  { %839 = shalt.err (!%p836_p2)
}
   0xb   :  { %s840_s8 = scalar_lea.vmem %s33_s22, 256  ;;  %p845_p4 = scmp.lt.s32.totalorder %s33_s22, %s33_s22 }
   0xc   :  { %p841_p3 = scmp.ne.s32.totalorder %s33_s22, %s840_s8  ;;  %p846_p5 = scmp.lt.s32.totalorder %s840_s8, %s840_s8 }
   0xe   :  { %p847_p6 = por %p846_p5, %p845_p4 }
  0x10   :  { %p848_p7 = pnand %p847_p6, %p841_p3 }
  0x12   :  { %851 = shalt.err (!%p848_p7)
}
  0x13   :  { %s950_s9 = smov 128   ;;  %s951_s10 = smov 8  }
  0x14   :  { %38 = dma.hbm_to_vmem [thread:$0]  %s1259_s1, 256, %s33_s22, [#allocation6], %s950_s9, %s950_s9, %s951_s10  }
  0x15   :  { %s852_s15 = scalar_lea.hbm %s1258_s0, 256 }
  0x16   :  { %p853_p8 = scmp.ne.s32.totalorder %s1258_s0, %s852_s15  ;;  %p856_p9 = scmp.lt.u32.totalorder %s852_s15, %s1258_s0 }
  0x18   :  { %p858_p10 = pnand %p856_p9, %p853_p8 }
  0x1a   :  { %861 = shalt.err (!%p858_p10)
}
  0x1b   :  { %s862_s20 = scalar_lea.vmem %s1005_s24, 256  ;;  %p867_p12 = scmp.lt.s32.totalorder %s1005_s24, %s1005_s24 }
  0x1c   :  { %p863_p11 = scmp.ne.s32.totalorder %s1005_s24, %s862_s20  ;;  %p868_p13 = scmp.lt.s32.totalorder %s862_s20, %s862_s20 }
  0x1e   :  { %p869_p0 = por %p868_p13, %p867_p12 }
  0x20   :  { %p870_p1 = pnand %p869_p0, %p863_p11 }
  0x22   :  { %873 = shalt.err (!%p870_p1)
}
  0x23   :  { %26 = dma.hbm_to_vmem [thread:$0]  %s1258_s0, 256, %s1005_s24, [#allocation3], %s950_s9, %s950_s9, %s951_s10  }
  0x24   :  { %s952_s22 = smov [#allocation7]   ;;  %s953_s25 = smov [#allocation8]  }
  0x25   :  { %s44_s23 = sshll.u32 %s952_s22, 4  ;;  %s58_s26 = sshll.u32 %s953_s25, 4  ;;  %s45_s23 = int_to_ptr.vmem [resolvable:$true] %s44_s23  ;;  %s1042_s26 = int_to_ptr.vmem [resolvable:$true] %s58_s26 }
  0x26   :  { %s874_s29 = scalar_lea.hbm %s1260_s2, 256 }
  0x27   :  { %p875_p2 = scmp.ne.s32.totalorder %s1260_s2, %s874_s29  ;;  %p878_p3 = scmp.lt.u32.totalorder %s874_s29, %s1260_s2 }
  0x29   :  { %p880_p4 = pnand %p878_p3, %p875_p2 }
  0x2b   :  { %883 = shalt.err (!%p880_p4)
}
  0x2c   :  { %s884_s0 = scalar_lea.vmem %s45_s23, 256  ;;  %p889_p6 = scmp.lt.s32.totalorder %s45_s23, %s45_s23 }
  0x2d   :  { %p885_p5 = scmp.ne.s32.totalorder %s45_s23, %s884_s0  ;;  %p890_p7 = scmp.lt.s32.totalorder %s884_s0, %s884_s0 }
  0x2f   :  { %p891_p8 = por %p890_p7, %p889_p6 }
  0x31   :  { %p892_p9 = pnand %p891_p8, %p885_p5 }
  0x33   :  { %895 = shalt.err (!%p892_p9)
}
  0x34   :  { %50 = dma.hbm_to_vmem [thread:$0]  %s1260_s2, 256, %s45_s23, [#allocation6], %s950_s9, %s950_s9, %s951_s10  }
  0x35   :  { %s896_s15 = scalar_lea.hbm %s1262_s4, 1024 }
  0x36   :  { %p897_p10 = scmp.ne.s32.totalorder %s1262_s4, %s896_s15  ;;  %p900_p11 = scmp.lt.u32.totalorder %s896_s15, %s1262_s4 }
  0x38   :  { %p902_p12 = pnand %p900_p11, %p897_p10 }
  0x3a   :  { %905 = shalt.err (!%p902_p12)
}
  0x3b   :  { %s906_s20 = scalar_lea.vmem %s1042_s26, 1024  ;;  %p911_p0 = scmp.lt.s32.totalorder %s1042_s26, %s1042_s26 }
  0x3c   :  { %p907_p13 = scmp.ne.s32.totalorder %s1042_s26, %s906_s20  ;;  %p912_p1 = scmp.lt.s32.totalorder %s906_s20, %s906_s20 }
  0x3e   :  { %p913_p2 = por %p912_p1, %p911_p0 }
  0x40   :  { %p914_p3 = pnand %p913_p2, %p907_p13 }
  0x42   :  { %917 = shalt.err (!%p914_p3)
}
  0x43   :  { %64 = dma.hbm_to_vmem [thread:$0]  %s1262_s4, 1024, %s1042_s26, [#allocation9], %s950_s9, %s950_s9, %s951_s10  }
  0x44   :  { %940 = dma.done.wait [#allocation3], 256  }
  0x45   :  { %941 = vsyncadd [#allocation3], 4294967040 }
  0x46   :  { %942 = dma.done.wait [#allocation6], 512  }
  0x47   :  { %943 = vsyncadd [#allocation6], 4294966784 }
  0x48   :  { %944 = dma.done.wait [#allocation9], 1024  }
  0x49   :  { %945 = vsyncadd [#allocation9], 4294966272  ;;  %v954_v0 = vmov 0   ;;  %vm99_vm0 = vcmask 1043456   ;;  %vm92_vm1 = vcmask 97280   ;;  %vm955_vm2 = vmmov 1  }
  0x4a   :  { %818 = vset.pattern.permute.xlu1 %v954_v0  ;;  %816 = vset.pattern.permute.xlu0 %v954_v0  ;;  %vm773_vm3 = vmpackc.low %vm99_vm0, %vm955_vm2  ;;  %v83_v1 = vld [vmem:[#allocation7] sm:$0xff]  ;;  %v84_v2 = vld [vmem:[#allocation7 + $0x8] sm:$0xf]  ;;  %v956_v8 = vmov 1   ;;  %v957_v9 = vmov 2   ;;  %v958_v10 = vmov 3   ;;  %v190_v27 = vlaneseq }
  0x4b   :  { %v1079_v3 = vld [vmem:[#allocation2] sm:$0xff]  ;;  %v772_v4 = vpack.c.bf16 %v84_v2, %v83_v1  ;;  %v82_v5 = vld [vmem:[#allocation5 + $0x8] sm:$0xff]  ;;  %v81_v6 = vld [vmem:[#allocation5] sm:$0xff]  ;;  %v959_v11 = vmov 4   ;;  %v960_v12 = vmov 5   ;;  %v961_v13 = vmov 7  }
  0x4c   :  { %747 = vmatprep.mubr.msk.f32.mxu0 %vm92_vm1, %v1079_v3  ;;  %187 = vperm.xlu1 %818, %v82_v5   ;;  %v1083_v7 = vld [vmem:[#allocation2 + $0x8] sm:$0xff]  ;;  %v962_v14 = vmov 6   ;;  %v340_v15 = vld [vmem:[#allocation8] sm:$0xff]  ;;  %v341_v16 = vld [vmem:[#allocation8 + $0x8] sm:$0xff]  ;;  %v191_v30 = vshrl.u32 %v190_v27, 7  ;;  %vm351_vm4 = vcmask 261120  }
  0x4d   :  { %182 = vperm.xlu0 %816, %v81_v6   ;;  %774 = vmatprep.subr.msk.bf16.mxu0 %vm773_vm3, %v772_v4  ;;  %v778_v17 = vpack.c.bf16 %v341_v16, %v340_v15  ;;  %v342_v18 = vld [vmem:[#allocation8 + $0x10] sm:$0xff]  ;;  %v343_v19 = vld [vmem:[#allocation8 + $0x18] sm:$0xff]  ;;  %s964_s22 = smov 44   ;;  %s965_s26 = smov 76   ;;  %vm655_vm5 = vcmask 359424   ;;  %vm658_vm6 = vcmask 621568  }
  0x4e   :  { %777 = vmatpush3.bf16.msk.msra.mxu0 %vm773_vm3, %v772_v4  ;;  %v782_v20 = vpack.c.bf16 %v343_v19, %v342_v18  ;;  %v716_v31 = vld [vmem:[%s1261_s3] ss:$0 sm:$0xff]  ;;  %v1106_v35 = vsub.s32 0, %v191_v30  ;;  %v1108_v36 = vsub.s32 1, %v191_v30  ;;  %v1110_v37 = vsub.s32 2, %v191_v30  ;;  %s963_s3 = smov 12  }
  0x4f   :  { %779 = vmatprep.subr.bf16.mxu1 %v778_v17  ;;  %v1114_v40 = vsub.s32 3, %v191_v30  ;;  %v1122_v44 = vsub.s32 4, %v191_v30  ;;  %v1138_v52 = vsub.s32 5, %v191_v30  ;;  %v1156_v1 = vsub.s32 6, %v191_v30  ;;  %s967_s27 = smov [#allocation10]  }
  0x50   :  { %819 = vset.pattern.permute.xlu1 %v956_v8  ;;  %781 = vmatpush3.bf16.msra.mxu1 %v778_v17  ;;  %vm661_vm7 = vcmask 883712   ;;  %vm689_vm8 = vcmask 719872   ;;  %s702_s28 = sshll.u32 %s967_s27, 4  ;;  %s703_s28 = int_to_ptr.vmem [resolvable:$true] %s702_s28 }
  0x51   :  { %817 = vset.pattern.permute.xlu0 %v956_v8  ;;  %748 = vmatmul.mubr.msk.f32.vlgmr.msra.gmra.mrb[0].mxu0 %vm92_vm1, %v1083_v7  ;;  %s918_s29 = scalar_lea.vmem %s703_s28, 1024  ;;  %p923_p5 = scmp.lt.s32.totalorder %s703_s28, %s703_s28 }
  0x52   :  { %205 = vperm.xlu1 %819, %v82_v5   ;;  %201 = vperm.xlu0 %817, %v81_v6   ;;  %p919_p4 = scmp.ne.s32.totalorder %s703_s28, %s918_s29  ;;  %p924_p6 = scmp.lt.s32.totalorder %s918_s29, %s918_s29 }
  0x53   :  { %783 = vmatprep.subr.bf16.mxu1 %v782_v20 }
  0x54   :  { %785 = vmatpush3.bf16.msra.mxu1 %v782_v20  ;;  %p925_p7 = por %p924_p6, %p923_p5 }
  0x56   :  { %820 = vset.pattern.permute.xlu1 %v957_v9  ;;  %821 = vset.pattern.permute.xlu0 %v957_v9  ;;  %p926_p8 = pnand %p925_p7, %p919_p4 }
  0x57   :  { %221 = vperm.xlu1 %820, %v81_v6   ;;  %225 = vperm.xlu0 %821, %v82_v5  }
  0x5b   :  { %822 = vset.pattern.permute.xlu1 %v958_v10  ;;  %823 = vset.pattern.permute.xlu0 %v959_v11 }
  0x5c   :  { %241 = vperm.xlu1 %822, %v81_v6   ;;  %261 = vperm.xlu0 %823, %v81_v6  }
  0x60   :  { %245 = vperm.xlu1 %822, %v82_v5   ;;  %826 = vset.pattern.permute.xlu0 %v960_v12 }
  0x61   :  { %285 = vperm.xlu0 %826, %v82_v5  }
  0x64   :  { %824 = vset.pattern.permute.xlu1 %v959_v11  ;;  %v1166_v11 = vsub.s32 7, %v191_v30 }
  0x65   :  { %265 = vperm.xlu1 %824, %v82_v5   ;;  %828 = vset.pattern.permute.xlu0 %v961_v13 }
  0x66   :  { %321 = vperm.xlu0 %828, %v81_v6  }
  0x69   :  { %825 = vset.pattern.permute.xlu1 %v960_v12 }
  0x6a   :  { %281 = vperm.xlu1 %825, %v81_v6  }
  0x6e   :  { %827 = vset.pattern.permute.xlu1 %v962_v14 }
  0x6f   :  { %301 = vperm.xlu1 %827, %v81_v6  }
  0x73   :  { %305 = vperm.xlu1 %827, %v82_v5  }
  0x77   :  { %829 = vset.pattern.permute.xlu1 %v961_v13 }
  0x78   :  { %325 = vperm.xlu1 %829, %v82_v5  }
  0xcb   :  { %v1087_v21 = vpop.permute.xlu1 %187 }
  0xcc   :  { %v1095_v25 = vpop.permute.xlu0 %182 }
  0xd1   :  { %v1089_v22 = vpop.permute.xlu1 %205  ;;  %v1099_v28 = vpop.permute.xlu0 %201 }
  0xd6   :  { %v1091_v23 = vpop.permute.xlu1 %221  ;;  %v1112_v38 = vpop.permute.xlu0 %225 }
  0xdb   :  { %v1093_v24 = vpop.permute.xlu1 %241  ;;  %v1136_v51 = vpop.permute.xlu0 %261 }
  0xdf   :  { %v1097_v26 = vpop.permute.xlu1 %245 }
  0xe0   :  { %v1164_v10 = vpop.permute.xlu0 %285 }
  0xe4   :  { %v1101_v29 = vpop.permute.xlu1 %265 }
  0xe9   :  { %v1116_v41 = vpop.permute.xlu1 %281 }
  0xee   :  { %v1142_v54 = vpop.permute.xlu1 %301 }
  0xf2   :  { %v1168_v12 = vpop.permute.xlu1 %305 }
 0x124   :  { %v749_v32 = vpop.f32.mrb[0].mxu0 }
 0x125   :  { %v175_v33 = vadd.f32 %v749_v32, %v716_v31  ;;  %v169_v34 = vpop.f32.mrb[1].mxu0 }
 0x126   :  { %v170_v39 = vadd.f32 %v716_v31, %v169_v34 }
 0x127   :  { %v1118_v42 = vmax.f32 %v175_v33, 0.0 }
 0x128   :  { %v1120_v43 = vmax.f32 %v170_v39, 0.0 }
 0x129   :  { %v197_v45 = vrot.slane %v1118_v42, %v1106_v35  ;;  %v215_v46 = vrot.slane %v1118_v42, %v1108_v36  ;;  %v235_v47 = vrot.slane %v1118_v42, %v1110_v37  ;;  %633 = vrot.lane.b32.xlu0 %v1118_v42, %s963_s3  ;;  %v255_v48 = vrot.slane %v1118_v42, %v1114_v40 }
 0x12a   :  { %631 = vrot.lane.b32.xlu1 %v1120_v43, %s963_s3  ;;  %v275_v53 = vrot.slane %v1118_v42, %v1122_v44  ;;  %v193_v57 = vrot.slane %v1120_v43, %v1106_v35  ;;  %v211_v58 = vrot.slane %v1120_v43, %v1108_v36  ;;  %v231_v60 = vrot.slane %v1120_v43, %v1110_v37 }
 0x12b   :  { %v199_v49 = vmul.f32 %v197_v45, %v1087_v21  ;;  %v217_v50 = vmul.f32 %v215_v46, %v1089_v22  ;;  %v237_v56 = vmul.f32 %v235_v47, %v1112_v38  ;;  %v257_v59 = vmul.f32 %v255_v48, %v1097_v26  ;;  %v1185_v45 = vpop.permute.xlu0 %321  ;;  %v1187_v46 = vpop.permute.xlu1 %325 }
 0x12c   :  { %v198_v62 = vmul.f32 %v193_v57, %v1095_v25  ;;  %v216_v63 = vmul.f32 %v211_v58, %v1099_v28  ;;  %v251_v0 = vrot.slane %v1120_v43, %v1114_v40  ;;  %v277_v2 = vmul.f32 %v275_v53, %v1101_v29  ;;  %v532_v58 = vld [vmem:[#allocation8 + $0x20] sm:$0xff] }
 0x12d   :  { %v219_v55 = vadd.f32 %v217_v50, %v199_v49  ;;  %v295_v4 = vrot.slane %v1118_v42, %v1138_v52  ;;  %v236_v8 = vmul.f32 %v231_v60, %v1091_v23  ;;  %v271_v9 = vrot.slane %v1120_v43, %v1122_v44  ;;  %v534_v60 = vld [vmem:[#allocation8 + $0x30] sm:$0xff] }
 0x12e   :  { %v218_v6 = vadd.f32 %v216_v63, %v198_v62  ;;  %v256_v15 = vmul.f32 %v251_v0, %v1093_v24  ;;  %v291_v16 = vrot.slane %v1120_v43, %v1138_v52  ;;  %v315_v17 = vrot.slane %v1118_v42, %v1156_v1  ;;  %v535_v62 = vld [vmem:[#allocation8 + $0x38] sm:$0xff]  ;;  %v720_v0 = vld [vmem:[%s1263_s5] ss:$0 sm:$0xff] }
 0x12f   :  { %v239_v61 = vadd.f32 %v237_v56, %v219_v55  ;;  %v297_v18 = vmul.f32 %v295_v4, %v1164_v10  ;;  %v276_v20 = vmul.f32 %v271_v9, %v1136_v51  ;;  %v311_v27 = vrot.slane %v1120_v43, %v1156_v1 }
 0x130   :  { %v238_v14 = vadd.f32 %v236_v8, %v218_v6  ;;  %v331_v31 = vrot.slane %v1120_v43, %v1166_v11  ;;  %v296_v33 = vmul.f32 %v291_v16, %v1116_v41  ;;  %v317_v34 = vmul.f32 %v315_v17, %v1168_v12 }
 0x131   :  { %v259_v5 = vadd.f32 %v257_v59, %v239_v61  ;;  %v335_v39 = vrot.slane %v1118_v42, %v1166_v11  ;;  %v316_v48 = vmul.f32 %v311_v27, %v1142_v54  ;;  %v533_v59 = vld [vmem:[#allocation8 + $0x28] sm:$0xff]  ;;  %v790_v63 = vpack.c.bf16 %v535_v62, %v534_v60 }
 0x132   :  { %v258_v19 = vadd.f32 %v256_v15, %v238_v14  ;;  %v336_v50 = vmul.f32 %v331_v31, %v1185_v45  ;;  %v786_v61 = vpack.c.bf16 %v533_v59, %v532_v58 }
 0x133   :  { %v279_v13 = vadd.f32 %v277_v2, %v259_v5  ;;  %v337_v55 = vmul.f32 %v335_v39, %v1187_v46 }
 0x134   :  { %v278_v32 = vadd.f32 %v276_v20, %v258_v19  ;;  %787 = vmatprep.subr.bf16.mxu0 %v786_v61 }
 0x135   :  { %v299_v30 = vadd.f32 %v297_v18, %v279_v13  ;;  %789 = vmatpush3.bf16.msra.mxu0 %v786_v61 }
 0x136   :  { %v298_v47 = vadd.f32 %v296_v33, %v278_v32  ;;  %791 = vmatprep.subr.bf16.mxu0 %v790_v63 }
 0x137   :  { %v319_v49 = vadd.f32 %v317_v34, %v299_v30 }
 0x138   :  { %v318_v53 = vadd.f32 %v316_v48, %v298_v47 }
 0x139   :  { %v339_v57 = vadd.f32 %v337_v55, %v319_v49  ;;  %793 = vmatpush3.bf16.msra.mxu0 %v790_v63 }
 0x13a   :  { %v338_v56 = vadd.f32 %v336_v50, %v318_v53 }
 0x13c   :  { %758 = vmatprep.mubr.msk.f32.mxu1 %vm351_vm4, %v338_v56 }
 0x13d   :  { %759 = vmatmul.mubr.msk.f32.vlgmr.msra.gmra.mrb[0].mxu1 %vm351_vm4, %v339_v57 }
 0x210   :  { %v760_v2 = vpop.f32.mrb[0].mxu1 }
 0x211   :  { %v430_v4 = vadd.f32 %v760_v2, %v720_v0  ;;  %v424_v5 = vpop.f32.mrb[1].mxu1 }
 0x212   :  { %v425_v6 = vadd.f32 %v720_v0, %v424_v5  ;;  %v632_v5 = vpop.permute.xlu1 %631 }
 0x213   :  { %v434_v8 = vmax.f32 %v430_v4, 0.0 }
 0x214   :  { %v433_v9 = vmax.f32 %v425_v6, 0.0 }
 0x215   :  { %v436_v13 = vadd.f32 %v434_v8, %v1118_v42 }
 0x216   :  { %v435_v14 = vadd.f32 %v433_v9, %v1120_v43 }
 0x217   :  { %641 = vrot.lane.b32.xlu0 %v436_v13, %s964_s22  ;;  %v444_v15 = vrot.slane %v436_v13, %v1106_v35  ;;  %v454_v19 = vrot.slane %v436_v13, %v1108_v36  ;;  %v466_v43 = vrot.slane %v436_v13, %v1110_v37  ;;  %v478_v31 = vrot.slane %v436_v13, %v1114_v40 }
 0x218   :  { %639 = vrot.lane.b32.xlu1 %v435_v14, %s964_s22  ;;  %v440_v16 = vrot.slane %v435_v14, %v1106_v35  ;;  %v450_v17 = vrot.slane %v435_v14, %v1108_v36  ;;  %v462_v18 = vrot.slane %v435_v14, %v1110_v37  ;;  %v474_v20 = vrot.slane %v435_v14, %v1114_v40 }
 0x219   :  { %v486_v30 = vrot.slane %v435_v14, %v1122_v44  ;;  %v446_v33 = vmul.f32 %v444_v15, %v1087_v21  ;;  %v456_v34 = vmul.f32 %v454_v19, %v1089_v22  ;;  %v498_v39 = vrot.slane %v435_v14, %v1138_v52 }
 0x21a   :  { %v445_v27 = vmul.f32 %v440_v16, %v1095_v25  ;;  %v455_v42 = vmul.f32 %v450_v17, %v1099_v28  ;;  %v467_v35 = vmul.f32 %v462_v18, %v1091_v23  ;;  %v479_v36 = vmul.f32 %v474_v20, %v1093_v24 }
 0x21b   :  { %v458_v47 = vadd.f32 %v456_v34, %v446_v33  ;;  %v468_v28 = vmul.f32 %v466_v43, %v1112_v38  ;;  %v490_v37 = vrot.slane %v436_v13, %v1122_v44  ;;  %v491_v48 = vmul.f32 %v486_v30, %v1136_v51 }
 0x21c   :  { %v457_v32 = vadd.f32 %v455_v42, %v445_v27  ;;  %v510_v40 = vrot.slane %v435_v14, %v1156_v1  ;;  %v480_v21 = vmul.f32 %v478_v31, %v1097_v26  ;;  %v502_v22 = vrot.slane %v436_v13, %v1138_v52 }
 0x21d   :  { %v470_v23 = vadd.f32 %v468_v28, %v458_v47  ;;  %v503_v24 = vmul.f32 %v498_v39, %v1116_v41  ;;  %v522_v50 = vrot.slane %v435_v14, %v1166_v11  ;;  %v492_v38 = vmul.f32 %v490_v37, %v1101_v29 }
 0x21e   :  { %v469_v25 = vadd.f32 %v467_v35, %v457_v32  ;;  %v514_v44 = vrot.slane %v436_v13, %v1156_v1  ;;  %v515_v51 = vmul.f32 %v510_v40, %v1142_v54  ;;  %v504_v58 = vmul.f32 %v502_v22, %v1164_v10  ;;  %v724_v54 = vld [vmem:[%s1263_s5 + $0x1] ss:$0 sm:$0xff]  ;;  %s966_s5 = smov 108  }
 0x21f   :  { %v482_v55 = vadd.f32 %v480_v21, %v470_v23  ;;  %v526_v26 = vrot.slane %v436_v13, %v1166_v11  ;;  %v527_v52 = vmul.f32 %v522_v50, %v1185_v45  ;;  %v653_v15 = vsel %vm92_vm1, %v1079_v3, %v632_v5 }
 0x220   :  { %v481_v49 = vadd.f32 %v479_v36, %v469_v25  ;;  %v516_v60 = vmul.f32 %v514_v44, %v1168_v12 }
 0x221   :  { %v494_v57 = vadd.f32 %v492_v38, %v482_v55  ;;  %v528_v29 = vmul.f32 %v526_v26, %v1187_v46  ;;  %v634_v46 = vpop.permute.xlu0 %633 }
 0x222   :  { %v493_v53 = vadd.f32 %v491_v48, %v481_v49  ;;  %v654_v9 = vsel %vm92_vm1, %v1083_v7, %v634_v46 }
 0x223   :  { %v506_v41 = vadd.f32 %v504_v58, %v494_v57 }
 0x224   :  { %v505_v56 = vadd.f32 %v503_v24, %v493_v53 }
 0x225   :  { %v518_v62 = vadd.f32 %v516_v60, %v506_v41 }
 0x226   :  { %v517_v59 = vadd.f32 %v515_v51, %v505_v56 }
 0x227   :  { %v530_v1 = vadd.f32 %v528_v29, %v518_v62 }
 0x228   :  { %v529_v61 = vadd.f32 %v527_v52, %v517_v59 }
 0x22a   :  { %769 = vmatprep.mubr.msk.f32.mxu0 %vm351_vm4, %v529_v61 }
 0x22b   :  { %770 = vmatmul.mubr.msk.f32.vlgmr.msra.gmra.mrb[2].mxu0 %vm351_vm4, %v530_v1 }
 0x289   :  { %v642_v6 = vpop.permute.xlu0 %641 }
 0x28a   :  { %v640_v8 = vpop.permute.xlu1 %639  ;;  %v657_v16 = vsel %vm655_vm5, %v654_v9, %v642_v6 }
 0x2fe   :  { %v771_v10 = vpop.f32.mrb[2].mxu0 }
 0x2ff   :  { %v622_v11 = vadd.f32 %v771_v10, %v724_v54  ;;  %v616_v63 = vpop.f32.mrb[3].mxu0 }
 0x300   :  { %v617_v45 = vadd.f32 %v724_v54, %v616_v63 }
 0x301   :  { %v626_v0 = vmax.f32 %v622_v11, 0.0 }
 0x302   :  { %v625_v2 = vmax.f32 %v617_v45, 0.0 }
 0x303   :  { %v628_v12 = vadd.f32 %v626_v0, %v436_v13  ;;  %v656_v13 = vsel %vm655_vm5, %v653_v15, %v640_v8 }
 0x304   :  { %v627_v4 = vadd.f32 %v625_v2, %v435_v14 }
 0x305   :  { %649 = vrot.lane.b32.xlu0 %v628_v12, %s965_s26 }
 0x306   :  { %647 = vrot.lane.b32.xlu1 %v627_v4, %s965_s26 }
 0x377   :  { %v650_v17 = vpop.permute.xlu0 %649 }
 0x378   :  { %v660_v14 = vsel %vm658_vm6, %v657_v16, %v650_v17  ;;  %v648_v18 = vpop.permute.xlu1 %647 }
 0x379   :  { %v669_v19 = vsel %vm661_vm7, %v660_v14, -inf  ;;  %v659_v20 = vsel %vm658_vm6, %v656_v13, %v648_v18 }
 0x37a   :  { %v670_v27 = vrot.slane %v669_v19, 4  ;;  %v662_v42 = vsel %vm661_vm7, %v659_v20, -inf }
 0x37b   :  { %v663_v43 = vrot.slane %v662_v42, 4 }
 0x37c   :  { %v671_v30 = vmax.f32 %v669_v19, %v670_v27 }
 0x37d   :  { %v664_v31 = vmax.f32 %v662_v42, %v663_v43 }
 0x37e   :  { %v672_v32 = vrot.slane %v671_v30, 2 }
 0x37f   :  { %v665_v7 = vrot.slane %v664_v31, 2 }
 0x380   :  { %v673_v35 = vmax.f32 %v671_v30, %v672_v32 }
 0x381   :  { %v666_v33 = vmax.f32 %v664_v31, %v665_v7 }
 0x382   :  { %v674_v34 = vrot.slane %v673_v35, 1 }
 0x383   :  { %v667_v3 = vrot.slane %v666_v33, 1 }
 0x384   :  { %v675_v36 = vmax.f32 %v673_v35, %v674_v34 }
 0x385   :  { %v668_v39 = vmax.f32 %v666_v33, %v667_v3 }
 0x386   :  { %680 = vrot.lane.b32.xlu0 %v675_v36, %s966_s5 }
 0x387   :  { %678 = vrot.lane.b32.xlu1 %v668_v39, %s966_s5 }
 0x3f8   :  { %v681_v25 = vpop.permute.xlu0 %680 }
 0x3f9   :  { %v686_v47 = vsel %vm661_vm7, %v660_v14, %v681_v25  ;;  %v687_v28 = vsel %vm661_vm7, 0.0, %v681_v25  ;;  %694 = vst.msk [vmem:[#allocation10 + $0x28] sm:$0xff] %vm689_vm8, %v681_v25  ;;  %696 = vst.msk [vmem:[#allocation10 + $0x38] sm:$0xff] %vm689_vm8, %v681_v25  ;;  %v679_v37 = vpop.permute.xlu1 %678 }
 0x3fa   :  { %693 = vst [vmem:[#allocation10 + $0x20] sm:$0xff] %v686_v47  ;;  %695 = vst [vmem:[#allocation10 + $0x30] sm:$0xff] %v687_v28  ;;  %v684_v48 = vsel %vm661_vm7, %v659_v20, %v679_v37  ;;  %v685_v40 = vsel %vm661_vm7, 0.0, %v679_v37 }
 0x3fb   :  { %690 = vst.msk [vmem:[#allocation10 + $0x8] sm:$0xff] %vm689_vm8, %v679_v37  ;;  %692 = vst.msk [vmem:[#allocation10 + $0x18] sm:$0xff] %vm689_vm8, %v679_v37 }
 0x3fc   :  { %688 = vst [vmem:[#allocation10] sm:$0xff] %v684_v48  ;;  %691 = vst [vmem:[#allocation10 + $0x10] sm:$0xff] %v685_v40 }
 0x3fd   :  { %929 = shalt.err (!%p926_p8)
}
 0x3fe   :  { %s930_s8 = scalar_lea.hbm %s1264_s6, 1024 }
 0x3ff   :  { %p931_p9 = scmp.ne.s32.totalorder %s1264_s6, %s930_s8  ;;  %p934_p10 = scmp.lt.u32.totalorder %s930_s8, %s1264_s6 }
 0x401   :  { %p936_p11 = pnand %p934_p10, %p931_p9 }
 0x403   :  { %939 = shalt.err (!%p936_p11)
}
 0x404   :  { %s968_s13 = smov 256   ;;  %s969_s14 = smov 16  }
 0x405   :  { %708 = dma.vmem_to_hbm [thread:$0]  %s703_s28, 1024, %s1264_s6, [#allocation4], %s968_s13, %s968_s13, %s969_s14  }
 0x406   :  { %946 = dma.done.wait [#allocation4], 1024  }
 0x407   :  { %947 = vsyncadd [#allocation4], 4294966272 }
 0x408   :  { %712 = vsyncpa [#allocation3], 1 }
 0x409   :  { %713 = vsyncpa [#allocation6], 1 }
 0x40a   :  { %714 = vsyncpa [#allocation9], 1 }
 0x40b   :  { %715 = vsyncpa [#allocation4], 1 }

</bundles_post_ra>
